<compile_context>
chip_gen: v7x
topology: tpu7x:2x2x1
jax: 0.10.0
libtpu: 0.0.40
codegen_flags: <defaults>
</compile_context>

<pallas_src>
import functools

import jax
import jax.numpy as jnp
from jax.experimental import pallas as pl
from jax.experimental.pallas import tpu as pltpu


def _l1_sum_kernel(out_ref, hr_ref, acc_ref, *, tr, lane, rows,
                   chunks_per_group, needs_mask):
    c = pl.program_id(0)          # core-group axis ("parallel")
    i = pl.program_id(1)          # sequential reduction axis ("arbitrary")

    @pl.when(i == 0)
    def _():
        acc_ref[...] = jnp.zeros_like(acc_ref)

    d = jnp.abs(out_ref[...].astype(jnp.float32) - hr_ref[...].astype(jnp.float32))

    if needs_mask:
        # Global chunk index (un-clamped) -> global row ids; zero out rows that
        # fall past the valid extent (partial last tile / padded chunk count).
        g = c * chunks_per_group + i
        row_ids = g * tr + jax.lax.broadcasted_iota(jnp.int32, d.shape, 0)
        d = jnp.where(row_ids < rows, d, 0.0)

    # Fold (tr, 128) -> (tr//8, 8, 128) and accumulate with elementwise VPU adds
    # into the vreg-shaped accumulator (no cross-lane reduction per step).
    acc_ref[...] += jnp.sum(d.reshape(tr // 8, 8, lane), axis=0)


def l1_loss(out, hr, *, tile_rows=4096, lane=128):
    """Mean absolute error between `out` and `HR` (torch.nn.L1Loss semantics)."""
    assert out.shape == hr.shape, "L1Loss requires matching shapes"
    n = out.size

    out_flat = out.reshape(-1)
    hr_flat = hr.reshape(-1)

    rows = n // lane
    n_main = rows * lane

    # Flat tail (< 128 elements): plain-JAX glue, avoids any padded HBM copy.
    if n_main < n:
        tail_sum = jnp.sum(
            jnp.abs(out_flat[n_main:].astype(jnp.float32)
                    - hr_flat[n_main:].astype(jnp.float32)))
    else:
        tail_sum = jnp.float32(0.0)

    if rows == 0:  # tiny input: everything handled in glue
        return (tail_sum / n).astype(out.dtype)

    out_2d = out_flat[:n_main].reshape(rows, lane)   # free reshape, native dtype
    hr_2d = hr_flat[:n_main].reshape(rows, lane)

    # Block rows: multiple of 8 (sublane), capped by the input size and by a
    # VMEM budget that fits every chip's default scoped-VMEM limit
    # (2 inputs x 2 pipeline buffers x <=2 MiB f32).
    tr = min(tile_rows, ((rows + 7) // 8) * 8)
    total_chunks = pl.cdiv(rows, tr)

    # Shard chunks over 2 core-groups when possible (v7x megacore: ~2x).
    num_groups = 2 if total_chunks >= 2 else 1
    chunks_per_group = pl.cdiv(total_chunks, num_groups)
    padded_chunks = num_groups * chunks_per_group
    needs_mask = (rows % tr != 0) or (padded_chunks != total_chunks)

    # Clamp the block index so padded (fully-masked) chunks still DMA in-bounds.
    def in_idx(c, i):
        return (jnp.minimum(c * chunks_per_group + i, total_chunks - 1), 0)

    kernel = functools.partial(
        _l1_sum_kernel, tr=tr, lane=lane, rows=rows,
        chunks_per_group=chunks_per_group, needs_mask=needs_mask)

    partials = pl.pallas_call(
        kernel,
        out_shape=jax.ShapeDtypeStruct((num_groups * 8, lane), jnp.float32),
        grid_spec=pltpu.PrefetchScalarGridSpec(
            num_scalar_prefetch=0,
            grid=(num_groups, chunks_per_group),
            in_specs=[
                pl.BlockSpec((tr, lane), in_idx),
                pl.BlockSpec((tr, lane), in_idx),
            ],
            # Per-group lane-dense (8,128) accumulator resident across the
            # reduction axis (same block index for all i).
            out_specs=pl.BlockSpec((8, lane), lambda c, i: (c, 0)),
        ),
        compiler_params=pltpu.CompilerParams(
            dimension_semantics=("parallel", "arbitrary"),
        ),
    )(out_2d, hr_2d)

    total = jnp.sum(partials) + tail_sum   # single tiny cross-lane reduce in glue
    return (total / n).astype(out.dtype)


if __name__ == "__main__":
    key = jax.random.PRNGKey(0)
    k1, k2 = jax.random.split(key)
    # Shapes consistent with an SR output / HR target: (B, C, H, W) = (2, 4, 16, 16)
    out = jax.random.normal(k1, (2, 4, 16, 16), dtype=jnp.float32)
    HR = jax.random.normal(k2, (2, 4, 16, 16), dtype=jnp.float32)

    loss = l1_loss(out, HR)
    jax.block_until_ready(loss)

    # Sanity check against plain-JAX reference (mean |out - HR|).
    ref = jnp.mean(jnp.abs(out - HR))
    assert jnp.allclose(loss, ref, rtol=1e-5, atol=1e-6), (loss, ref)

    print("KERNEL_OK")
</pallas_src>

<mosaic_0001>
module attributes {stable_mosaic.version = 11 : i64} {
  func.func @_l1_sum_kernel(%arg0: i32, %arg1: i32, %arg2: memref<16x128xf32, #tpu.memory_space<vmem>>, %arg3: memref<16x128xf32, #tpu.memory_space<vmem>>, %arg4: memref<8x128xf32, #tpu.memory_space<vmem>>) attributes {dimension_semantics = [#tpu.dimension_semantics<parallel>, #tpu.dimension_semantics<arbitrary>], iteration_bounds = array<i64: 1, 1>, scalar_prefetch = 0 : i64, scratch_operands = 0 : i64, tpu.core_type = #tpu.core_type<tc>, window_params = [{transform_indices = @transform_0, window_bounds = array<i64: 16, 128>}, {transform_indices = @transform_1, window_bounds = array<i64: 16, 128>}, {transform_indices = @transform_2, window_bounds = array<i64: 8, 128>}]} {
    %c0_i32 = arith.constant 0 : i32
    %0 = arith.cmpi eq, %arg1, %c0_i32 : i32
    %1 = arith.extui %0 : i1 to i32
    %c0_i32_0 = arith.constant 0 : i32
    %2 = arith.cmpi ne, %1, %c0_i32_0 : i32
    scf.if %2 {
      %cst_8 = arith.constant 0.000000e+00 : f32
      %12 = vector.broadcast %cst_8 : f32 to vector<8x128xf32>
      %c0_9 = arith.constant 0 : index
      %c0_10 = arith.constant 0 : index
      %13 = vector.load %arg4[%c0_9, %c0_10] : memref<8x128xf32, #tpu.memory_space<vmem>>, vector<8x128xf32>
      tpu.vector_store %arg4[%c0_9, %c0_10], %12 {strides = array<i32>} : memref<8x128xf32, #tpu.memory_space<vmem>>, vector<8x128xf32>,
    } else {
    }
    %c0 = arith.constant 0 : index
    %c0_1 = arith.constant 0 : index
    %3 = vector.load %arg2[%c0, %c0_1] : memref<16x128xf32, #tpu.memory_space<vmem>>, vector<16x128xf32>
    %c0_2 = arith.constant 0 : index
    %c0_3 = arith.constant 0 : index
    %4 = vector.load %arg3[%c0_2, %c0_3] : memref<16x128xf32, #tpu.memory_space<vmem>>, vector<16x128xf32>
    %5 = arith.subf %3, %4 : vector<16x128xf32>
    %6 = math.absf %5 : vector<16x128xf32>
    %c0_4 = arith.constant 0 : index
    %c0_5 = arith.constant 0 : index
    %7 = vector.load %arg4[%c0_4, %c0_5] : memref<8x128xf32, #tpu.memory_space<vmem>>, vector<8x128xf32>
    %8 = vector.shape_cast %6 : vector<16x128xf32> to vector<2x8x128xf32>
    %cst = arith.constant dense<0.000000e+00> : vector<8x128xf32>
    %9 = vector.multi_reduction <add>, %8, %cst [0] : vector<2x8x128xf32> to vector<8x128xf32>
    %10 = arith.addf %7, %9 : vector<8x128xf32>
    %c0_6 = arith.constant 0 : index
    %c0_7 = arith.constant 0 : index
    %11 = vector.load %arg4[%c0_6, %c0_7] : memref<8x128xf32, #tpu.memory_space<vmem>>, vector<8x128xf32>
    tpu.vector_store %arg4[%c0_6, %c0_7], %10 {strides = array<i32>} : memref<8x128xf32, #tpu.memory_space<vmem>>, vector<8x128xf32>,
    return
  }
  func.func @transform_0(%arg0: i32, %arg1: i32) -> (i32, i32) {
    %c1_i32 = arith.constant 1 : i32
    %0 = arith.muli %arg0, %c1_i32 : i32
    %1 = arith.addi %0, %arg1 : i32
    %c0_i32 = arith.constant 0 : i32
    %2 = arith.minsi %1, %c0_i32 : i32
    %c0_i32_0 = arith.constant 0 : i32
    %c0_i32_1 = arith.constant 0 : i32
    return %2, %c0_i32_0 : i32, i32
  }
  func.func @transform_1(%arg0: i32, %arg1: i32) -> (i32, i32) {
    %c1_i32 = arith.constant 1 : i32
    %0 = arith.muli %arg0, %c1_i32 : i32
    %1 = arith.addi %0, %arg1 : i32
    %c0_i32 = arith.constant 0 : i32
    %2 = arith.minsi %1, %c0_i32 : i32
    %c0_i32_0 = arith.constant 0 : i32
    %c0_i32_1 = arith.constant 0 : i32
    return %2, %c0_i32_0 : i32, i32
  }
  func.func @transform_2(%arg0: i32, %arg1: i32) -> (i32, i32) {
    %c0_i32 = arith.constant 0 : i32
    %c0_i32_0 = arith.constant 0 : i32
    return %arg0, %c0_i32 : i32, i32
  }
}

</mosaic_0001>

<bundles_post_ra>
// kernel: tpu_custom_call.1
= control target key start
LH: loop header
LB: loop body
LE: loop exit
PB: predicated region body
PF: predicated region fallthrough
CT: control target
= control target key end

     0   :  { %7 = vsyncpa [#allocation3], 0  ;;  %s231_s0 = inlined_call_operand.hbm [shape: f32[16,128], index: 0, kind: input, shape index: {}]   ;;  %s232_s1 = inlined_call_operand.hbm [shape: f32[16,128], index: 1, kind: input, shape index: {}]   ;;  %s233_s2 = inlined_call_operand.hbm [shape: f32[8,128], index: 2, kind: output, shape index: {}]  }
   0x1   :  { %8 = vsyncpa [#allocation6], 0 }
   0x2   :  { %9 = vsyncpa [#allocation4], 0  ;;  %s175_s9 = smov [#allocation2]   ;;  %s103_s13 = scalar_lea.hbm %s231_s0, 256 }
   0x3   :  { %s21_s10 = sshll.u32 %s175_s9, 4  ;;  %p104_p0 = scmp.ne.s32.totalorder %s231_s0, %s103_s13  ;;  %s22_s10 = int_to_ptr.vmem [resolvable:$true] %s21_s10 }
   0x4   :  { %p107_p1 = scmp.lt.u32.totalorder %s103_s13, %s231_s0 }
   0x6   :  { %p109_p2 = pnand %p107_p1, %p104_p0 }
   0x8   :  { %112 = shalt.err (!%p109_p2)
}
   0x9   :  { %s113_s18 = scalar_lea.vmem %s22_s10, 256  ;;  %p118_p4 = scmp.lt.s32.totalorder %s22_s10, %s22_s10 }
   0xa   :  { %p114_p3 = scmp.ne.s32.totalorder %s22_s10, %s113_s18  ;;  %p119_p5 = scmp.lt.s32.totalorder %s113_s18, %s113_s18 }
   0xc   :  { %p120_p6 = por %p119_p5, %p118_p4 }
   0xe   :  { %p121_p7 = pnand %p120_p6, %p114_p3 }
  0x10   :  { %124 = shalt.err (!%p121_p7)
}
  0x11   :  { %s176_s19 = smov 128   ;;  %s177_s20 = smov 8  }
  0x12   :  { %27 = dma.hbm_to_vmem [thread:$0]  %s231_s0, 256, %s22_s10, [#allocation3], %s176_s19, %s176_s19, %s177_s20  }
  0x13   :  { %s178_s23 = smov [#allocation5]   ;;  %s125_s27 = scalar_lea.hbm %s232_s1, 256 }
  0x14   :  { %s39_s24 = sshll.u32 %s178_s23, 4  ;;  %p126_p8 = scmp.ne.s32.totalorder %s232_s1, %s125_s27  ;;  %s40_s24 = int_to_ptr.vmem [resolvable:$true] %s39_s24 }
  0x15   :  { %p129_p9 = scmp.lt.u32.totalorder %s125_s27, %s232_s1 }
  0x17   :  { %p131_p10 = pnand %p129_p9, %p126_p8 }
  0x19   :  { %134 = shalt.err (!%p131_p10)
}
  0x1a   :  { %s135_s4 = scalar_lea.vmem %s40_s24, 256  ;;  %p140_p12 = scmp.lt.s32.totalorder %s40_s24, %s40_s24 }
  0x1b   :  { %p136_p11 = scmp.ne.s32.totalorder %s40_s24, %s135_s4  ;;  %p141_p13 = scmp.lt.s32.totalorder %s135_s4, %s135_s4 }
  0x1d   :  { %p142_p0 = por %p141_p13, %p140_p12 }
  0x1f   :  { %p143_p1 = pnand %p142_p0, %p136_p11 }
  0x21   :  { %146 = shalt.err (!%p143_p1)
}
  0x22   :  { %45 = dma.hbm_to_vmem [thread:$0]  %s232_s1, 256, %s40_s24, [#allocation6], %s176_s19, %s176_s19, %s177_s20  }
  0x23   :  { %169 = dma.done.wait [#allocation3], 256  }
  0x24   :  { %170 = vsyncadd [#allocation3], 4294967040 }
  0x25   :  { %171 = dma.done.wait [#allocation6], 256  }
  0x26   :  { %172 = vsyncadd [#allocation6], 4294967040  ;;  %v65_v0 = vld [vmem:[#allocation2] sm:$0xff]  ;;  %v66_v1 = vld [vmem:[#allocation2 + $0x8] sm:$0xff]  ;;  %s179_s6 = smov [#allocation7]  }
  0x27   :  { %v67_v2 = vld [vmem:[#allocation5] sm:$0xff]  ;;  %v68_v3 = vld [vmem:[#allocation5 + $0x8] sm:$0xff]  ;;  %s83_s7 = sshll.u32 %s179_s6, 4  ;;  %s84_s7 = int_to_ptr.vmem [resolvable:$true] %s83_s7 }
  0x28   :  { %v69_v4 = vsub.f32 %v65_v0, %v67_v2  ;;  %v70_v5 = vsub.f32 %v66_v1, %v68_v3  ;;  %s147_s8 = scalar_lea.vmem %s84_s7, 128  ;;  %p152_p3 = scmp.lt.s32.totalorder %s84_s7, %s84_s7 }
  0x29   :  { %p148_p2 = scmp.ne.s32.totalorder %s84_s7, %s147_s8  ;;  %p153_p4 = scmp.lt.s32.totalorder %s147_s8, %s147_s8 }
  0x2a   :  { %v71_v6 = vand.u32 2147483647, %v69_v4  ;;  %v72_v7 = vand.u32 2147483647, %v70_v5 }
  0x2b   :  { %p154_p5 = por %p153_p4, %p152_p3 }
  0x2c   :  { %v74_v8 = vadd.f32 %v72_v7, %v71_v6 }
  0x2d   :  { %p155_p6 = pnand %p154_p5, %p148_p2 }
  0x2e   :  { %76 = vst [vmem:[#allocation7] sm:$0xff] %v74_v8 }
  0x2f   :  { %158 = shalt.err (!%p155_p6)
}
  0x30   :  { %s159_s10 = scalar_lea.hbm %s233_s2, 128 }
  0x31   :  { %p160_p7 = scmp.ne.s32.totalorder %s233_s2, %s159_s10  ;;  %p163_p8 = scmp.lt.u32.totalorder %s159_s10, %s233_s2 }
  0x33   :  { %p165_p9 = pnand %p163_p8, %p160_p7 }
  0x35   :  { %168 = shalt.err (!%p165_p9)
}
  0x36   :  { %86 = dma.vmem_to_hbm [thread:$0]  %s84_s7, 128, %s233_s2, [#allocation4]  }
  0x37   :  { %173 = dma.done.wait [#allocation4], 128  }
  0x38   :  { %174 = vsyncadd [#allocation4], 4294967168 }
  0x39   :  { %90 = vsyncpa [#allocation3], 1 }
  0x3a   :  { %91 = vsyncpa [#allocation6], 1 }
  0x3b   :  { %92 = vsyncpa [#allocation4], 1 }

</bundles_post_ra>
